<compile_context>
chip_gen: v6e
topology: v6e:2x2x1
jax: 0.10.0
libtpu: 0.0.40
codegen_flags: <defaults>
</compile_context>

<pallas_src>
import math
from functools import partial

import jax
import jax.numpy as jnp
from jax.experimental import pallas as pl
from jax.experimental.pallas import tpu as pltpu


def _attn_dropout_kernel(mask_ref, q_ref, kt_ref, v_ref, o_ref, *, keep_scale):
    # mask_ref: (1, Lq, Lk) uint8 keep-mask (1 = keep, 0 = drop)
    # q_ref:    (1, Lq, D)  bf16
    # kt_ref:   (1, D,  Lk) bf16   (key pre-transposed in the wrapper)
    # v_ref:    (1, Lk, D)  bf16
    # o_ref:    (1, Lq, D)  f32

    # QK matmul: plain (Lq,D)@(D,Lk) MXU feed, f32 accumulation.
    qk = jnp.dot(q_ref[0], kt_ref[0],
                 preferred_element_type=jnp.float32)          # (Lq, Lk) f32

    # Numerically stable softmax over the last dim (f32 on VPU/EUP).
    m = jnp.max(qk, axis=-1, keepdims=True)
    e = jnp.exp(qk - m)
    s = jnp.sum(e, axis=-1, keepdims=True)
    inv = pl.reciprocal(s, approx=True)                       # EUP slot, ~free

    # Dropout keep-mask (uint8 -> f32 on VPU) + fold the 1/(1-p) scale into
    # the softmax-normalization multiply: one pass over the (Lq, Lk) tile.
    keep = mask_ref[0].astype(jnp.float32)                    # (Lq, Lk)
    p_drop = e * keep * (inv * keep_scale)                    # (Lq, Lk) f32

    # output = dropout(softmax(qk)) @ value  (bf16 MXU inputs, f32 accum).
    out = jnp.dot(p_drop.astype(jnp.bfloat16), v_ref[0],
                  preferred_element_type=jnp.float32)         # (Lq, D) f32
    o_ref[0] = out.astype(o_ref.dtype)


def _attn_eval_kernel(q_ref, kt_ref, v_ref, o_ref):
    # Inference / p == 0 path: no mask stream, no mask multiply.
    qk = jnp.dot(q_ref[0], kt_ref[0],
                 preferred_element_type=jnp.float32)          # (Lq, Lk) f32
    m = jnp.max(qk, axis=-1, keepdims=True)
    e = jnp.exp(qk - m)
    s = jnp.sum(e, axis=-1, keepdims=True)
    inv = pl.reciprocal(s, approx=True)
    p = e * inv
    out = jnp.dot(p.astype(jnp.bfloat16), v_ref[0],
                  preferred_element_type=jnp.float32)
    o_ref[0] = out.astype(o_ref.dtype)


def attention_dropout(scaled_query, key, value, dropout_p, *, rng_key=None,
                      training=True):
    """Forward pass of the PyTorch Model: matmul -> softmax -> dropout -> matmul."""
    B, Lq, D = scaled_query.shape
    Bk, Lk, Dk = key.shape
    assert Bk == B and Dk == D and value.shape == (B, Lk, D)

    out_dtype = scaled_query.dtype

    # One-time wrapper-side layout/dtype plumbing (not per-step work):
    #   bf16 MXU inputs, key pre-transposed to (B, D, Lk).
    q_bf = scaled_query.astype(jnp.bfloat16)
    kt_bf = jnp.swapaxes(key, -2, -1).astype(jnp.bfloat16)     # (B, D, Lk)
    v_bf = value.astype(jnp.bfloat16)

    qkv_specs = [
        pl.BlockSpec((1, Lq, D), lambda b: (b, 0, 0)),         # scaled_query
        pl.BlockSpec((1, D, Lk), lambda b: (b, 0, 0)),         # key^T
        pl.BlockSpec((1, Lk, D), lambda b: (b, 0, 0)),         # value
    ]
    out_spec = pl.BlockSpec((1, Lq, D), lambda b: (b, 0, 0))
    cparams = pltpu.CompilerParams(dimension_semantics=("parallel",))

    if (not training) or dropout_p == 0.0:
        return pl.pallas_call(
            _attn_eval_kernel,
            out_shape=jax.ShapeDtypeStruct((B, Lq, D), out_dtype),
            grid=(B,),
            in_specs=qkv_specs,
            out_specs=out_spec,
            compiler_params=cparams,
        )(q_bf, kt_bf, v_bf)

    if dropout_p >= 1.0:
        raise ValueError("dropout_p must be < 1.0 (scale 1/(1-p) would be inf)")
    if rng_key is None:
        # PyTorch dropout draws a fresh mask every forward call; silently
        # reusing PRNGKey(0) would diverge from that semantics.
        raise ValueError("training dropout requires an explicit rng_key per call")

    # uint8 keep-mask (1 = keep): 4x smaller than an f32 mask stream.
    keep_u8 = jax.random.bernoulli(rng_key, 1.0 - dropout_p,
                                   (B, Lq, Lk)).astype(jnp.uint8)
    keep_scale = float(1.0 / (1.0 - dropout_p))

    return pl.pallas_call(
        partial(_attn_dropout_kernel, keep_scale=keep_scale),
        out_shape=jax.ShapeDtypeStruct((B, Lq, D), out_dtype),
        grid=(B,),
        in_specs=[pl.BlockSpec((1, Lq, Lk), lambda b: (b, 0, 0))] + qkv_specs,
        out_specs=out_spec,
        compiler_params=cparams,
    )(keep_u8, q_bf, kt_bf, v_bf)


if __name__ == "__main__":
    # Shapes from the PyTorch module.
    B, Lq, Lk, D = 1, 6, 13, 768
    dropout_p = 0.2
    _ = 1.0 / math.sqrt(D)   # inv_scale_factor exists in the module but is unused in forward

    root = jax.random.PRNGKey(0)
    k_key, k_val, k_sq, k_drop = jax.random.split(root, 4)

    key_param = jax.random.normal(k_key, (B, Lk, D), dtype=jnp.float32)
    value_param = jax.random.normal(k_val, (B, Lk, D), dtype=jnp.float32)
    scaled_query = jax.random.normal(k_sq, (B, Lq, D), dtype=jnp.float32)

    # --- training path (dropout active) ---
    out = attention_dropout(scaled_query, key_param, value_param, dropout_p,
                            rng_key=k_drop, training=True)
    jax.block_until_ready(out)
    assert out.shape == (B, Lq, D) and out.dtype == jnp.float32
    assert bool(jnp.isfinite(out).all())

    # Pure-JAX reference with identical precision choices (bf16 MXU inputs,
    # f32 accumulation) and the same deterministic dropout mask.
    keep_ref = jax.random.bernoulli(k_drop, 1.0 - dropout_p,
                                    (B, Lq, Lk)).astype(jnp.float32)
    qk_ref = jnp.einsum("bqd,bkd->bqk",
                        scaled_query.astype(jnp.bfloat16),
                        key_param.astype(jnp.bfloat16),
                        preferred_element_type=jnp.float32)
    p_ref = jax.nn.softmax(qk_ref, axis=-1) * keep_ref * (1.0 / (1.0 - dropout_p))
    ref = jnp.einsum("bqk,bkd->bqd",
                     p_ref.astype(jnp.bfloat16),
                     value_param.astype(jnp.bfloat16),
                     preferred_element_type=jnp.float32)
    assert bool(jnp.allclose(out, ref, rtol=2e-2, atol=2e-2))

    # --- eval path (dropout = identity) ---
    out_eval = attention_dropout(scaled_query, key_param, value_param,
                                 dropout_p, training=False)
    jax.block_until_ready(out_eval)
    p_ref_eval = jax.nn.softmax(qk_ref, axis=-1)
    ref_eval = jnp.einsum("bqk,bkd->bqd",
                          p_ref_eval.astype(jnp.bfloat16),
                          value_param.astype(jnp.bfloat16),
                          preferred_element_type=jnp.float32)
    assert bool(jnp.allclose(out_eval, ref_eval, rtol=2e-2, atol=2e-2))

    print("KERNEL_OK")
</pallas_src>

<mosaic_0001>
module attributes {stable_mosaic.version = 11 : i64} {
  func.func @_attn_dropout_kernel(%arg0: i32, %arg1: memref<1x6x13xi8, #tpu.memory_space<vmem>>, %arg2: memref<1x6x768xbf16, #tpu.memory_space<vmem>>, %arg3: memref<1x768x13xbf16, #tpu.memory_space<vmem>>, %arg4: memref<1x13x768xbf16, #tpu.memory_space<vmem>>, %arg5: memref<1x6x768xf32, #tpu.memory_space<vmem>>) attributes {dimension_semantics = [#tpu.dimension_semantics<parallel>], iteration_bounds = array<i64: 1>, scalar_prefetch = 0 : i64, scratch_operands = 0 : i64, tpu.core_type = #tpu.core_type<tc>, window_params = [{transform_indices = @transform_0, window_bounds = array<i64: 1, 6, 13>}, {transform_indices = @transform_1, window_bounds = array<i64: 1, 6, 768>}, {transform_indices = @transform_2, window_bounds = array<i64: 1, 768, 13>}, {transform_indices = @transform_3, window_bounds = array<i64: 1, 13, 768>}, {transform_indices = @transform_4, window_bounds = array<i64: 1, 6, 768>}]} {
    %c0 = arith.constant 0 : index
    %c0_0 = arith.constant 0 : index
    %c0_1 = arith.constant 0 : index
    %0 = vector.load %arg2[%c0, %c0_0, %c0_1] : memref<1x6x768xbf16, #tpu.memory_space<vmem>>, vector<1x6x768xbf16>
    %1 = vector.shape_cast %0 : vector<1x6x768xbf16> to vector<6x768xbf16>
    %c0_2 = arith.constant 0 : index
    %c0_3 = arith.constant 0 : index
    %c0_4 = arith.constant 0 : index
    %2 = vector.load %arg3[%c0_2, %c0_3, %c0_4] : memref<1x768x13xbf16, #tpu.memory_space<vmem>>, vector<1x768x13xbf16>
    %3 = vector.shape_cast %2 : vector<1x768x13xbf16> to vector<768x13xbf16>
    %cst = arith.constant dense<0.000000e+00> : vector<6x13xf32>
    %4 = tpu.matmul %1, %3, %cst {dimension_numbers = #tpu.dot_dimension_numbers<[1], [0], [0], [1], [0, 0, 1, 1], [], []>} : vector<6x768xbf16>, vector<768x13xbf16>, vector<6x13xf32> -> vector<6x13xf32>
    %cst_5 = arith.constant dense<0xFF800000> : vector<6xf32>
    %5 = vector.multi_reduction <maximumf>, %4, %cst_5 [1] : vector<6x13xf32> to vector<6xf32>
    %6 = vector.shape_cast %5 : vector<6xf32> to vector<6x1xf32>
    %7 = vector.broadcast %6 : vector<6x1xf32> to vector<6x13xf32>
    %8 = arith.subf %4, %7 : vector<6x13xf32>
    %9 = math.exp %8 : vector<6x13xf32>
    %cst_6 = arith.constant dense<0.000000e+00> : vector<6xf32>
    %10 = vector.multi_reduction <add>, %9, %cst_6 [1] : vector<6x13xf32> to vector<6xf32>
    %11 = vector.shape_cast %10 : vector<6xf32> to vector<6x1xf32>
    %12 = tpu.reciprocal %11 {approx = true} : vector<6x1xf32> -> vector<6x1xf32>
    %c0_7 = arith.constant 0 : index
    %c0_8 = arith.constant 0 : index
    %c0_9 = arith.constant 0 : index
    %13 = vector.load %arg1[%c0_7, %c0_8, %c0_9] : memref<1x6x13xi8, #tpu.memory_space<vmem>>, vector<1x6x13xi8>
    %14 = vector.shape_cast %13 : vector<1x6x13xi8> to vector<6x13xi8>
    %15 = arith.uitofp %14 : vector<6x13xi8> to vector<6x13xf32>
    %16 = arith.mulf %9, %15 : vector<6x13xf32>
    %cst_10 = arith.constant 1.250000e+00 : f32
    %17 = vector.broadcast %cst_10 : f32 to vector<6x1xf32>
    %18 = arith.mulf %12, %17 : vector<6x1xf32>
    %19 = vector.broadcast %18 : vector<6x1xf32> to vector<6x13xf32>
    %20 = arith.mulf %16, %19 : vector<6x13xf32>
    %21 = arith.truncf %20 : vector<6x13xf32> to vector<6x13xbf16>
    %c0_11 = arith.constant 0 : index
    %c0_12 = arith.constant 0 : index
    %c0_13 = arith.constant 0 : index
    %22 = vector.load %arg4[%c0_11, %c0_12, %c0_13] : memref<1x13x768xbf16, #tpu.memory_space<vmem>>, vector<1x13x768xbf16>
    %23 = vector.shape_cast %22 : vector<1x13x768xbf16> to vector<13x768xbf16>
    %cst_14 = arith.constant dense<0.000000e+00> : vector<6x768xf32>
    %24 = tpu.matmul %21, %23, %cst_14 {dimension_numbers = #tpu.dot_dimension_numbers<[1], [0], [0], [1], [0, 0, 1, 1], [], []>} : vector<6x13xbf16>, vector<13x768xbf16>, vector<6x768xf32> -> vector<6x768xf32>
    %c0_15 = arith.constant 0 : index
    %c0_16 = arith.constant 0 : index
    %c0_17 = arith.constant 0 : index
    %25 = vector.load %arg5[%c0_15, %c0_16, %c0_17] : memref<1x6x768xf32, #tpu.memory_space<vmem>>, vector<1x6x768xf32>
    %26 = vector.shape_cast %25 : vector<1x6x768xf32> to vector<6x768xf32>
    %27 = vector.shape_cast %24 : vector<6x768xf32> to vector<1x6x768xf32>
    tpu.vector_store %arg5[%c0_15, %c0_16, %c0_17], %27 {strides = array<i32>} : memref<1x6x768xf32, #tpu.memory_space<vmem>>, vector<1x6x768xf32>,
    return
  }
  func.func @transform_0(%arg0: i32) -> (i32, i32, i32) {
    %c0_i32 = arith.constant 0 : i32
    %c0_i32_0 = arith.constant 0 : i32
    %c0_i32_1 = arith.constant 0 : i32
    return %arg0, %c0_i32, %c0_i32_0 : i32, i32, i32
  }
  func.func @transform_1(%arg0: i32) -> (i32, i32, i32) {
    %c0_i32 = arith.constant 0 : i32
    %c0_i32_0 = arith.constant 0 : i32
    %c0_i32_1 = arith.constant 0 : i32
    return %arg0, %c0_i32, %c0_i32_0 : i32, i32, i32
  }
  func.func @transform_2(%arg0: i32) -> (i32, i32, i32) {
    %c0_i32 = arith.constant 0 : i32
    %c0_i32_0 = arith.constant 0 : i32
    %c0_i32_1 = arith.constant 0 : i32
    return %arg0, %c0_i32, %c0_i32_0 : i32, i32, i32
  }
  func.func @transform_3(%arg0: i32) -> (i32, i32, i32) {
    %c0_i32 = arith.constant 0 : i32
    %c0_i32_0 = arith.constant 0 : i32
    %c0_i32_1 = arith.constant 0 : i32
    return %arg0, %c0_i32, %c0_i32_0 : i32, i32, i32
  }
  func.func @transform_4(%arg0: i32) -> (i32, i32, i32) {
    %c0_i32 = arith.constant 0 : i32
    %c0_i32_0 = arith.constant 0 : i32
    %c0_i32_1 = arith.constant 0 : i32
    return %arg0, %c0_i32, %c0_i32_0 : i32, i32, i32
  }
}

</mosaic_0001>

<bundles_post_ra>
// kernel: tpu_custom_call.1
= control target key start
LH: loop header
LB: loop body
LE: loop exit
PB: predicated region body
PF: predicated region fallthrough
CT: control target
= control target key end

     0   :  { %vm546_vm0 = vcmask 103424   ;;  %vm599_vm1 = vcmask 1045504   ;;  %vm600_vm2 = vcmask 1046528   ;;  %vm595_vm3 = vcmask 105472   ;;  %s1171_s2 = inlined_call_operand.vmem [shape: bf16[1,768,13], index: 2, kind: input, shape index: {}]   ;;  %s1172_s1 = inlined_call_operand.vmem [shape: bf16[1,6,768], index: 1, kind: input, shape index: {}]   ;;  %s1173_s3 = inlined_call_operand.vmem [shape: bf16[1,13,768], index: 3, kind: input, shape index: {}]   ;;  %s1174_s0 = inlined_call_operand.vmem [shape: u8[1,6,13], index: 0, kind: input, shape index: {}]   ;;  %s1175_s4 = inlined_call_operand.vmem [shape: f32[1,6,768], index: 4, kind: output, shape index: {}]  }
   0x1   :  { %v885_v0 = vld [vmem:[%s1171_s2 + $0x78] sm:$0xff]   ;;  %v889_v4 = vld [vmem:[%s1171_s2 + $0x70] sm:$0xff]   ;;  %v893_v8 = vld [vmem:[%s1171_s2 + $0x68] sm:$0xff]  }
   0x2   :  { %v886_v1 = vld [vmem:[%s1171_s2 + $0xf8] sm:$0xff]   ;;  %817 = vmatprep.subr.bf16.mxu0 %v885_v0  ;;  %v890_v5 = vld [vmem:[%s1171_s2 + $0xf0] sm:$0xff]   ;;  %v894_v9 = vld [vmem:[%s1171_s2 + $0xe8] sm:$0xff]  }
   0x3   :  { %v887_v2 = vld [vmem:[%s1171_s2 + $0x38] sm:$0xff]   ;;  %839 = vmatprep.subr.bf16.mxu1 %v886_v1  ;;  %v891_v6 = vld [vmem:[%s1171_s2 + $0x30] sm:$0xff]   ;;  %v895_v10 = vld [vmem:[%s1171_s2 + $0x28] sm:$0xff]  }
   0x4   :  { %v888_v3 = vld [vmem:[%s1171_s2 + $0xb8] sm:$0xff]   ;;  %818 = vmatpush3.bf16.msra.mxu0 %v887_v2  ;;  %v892_v7 = vld [vmem:[%s1171_s2 + $0xb0] sm:$0xff]   ;;  %v896_v11 = vld [vmem:[%s1171_s2 + $0xa8] sm:$0xff]  }
   0x5   :  { %840 = vmatpush3.bf16.msra.mxu1 %v888_v3  ;;  %819 = vmatprep.subr.bf16.mxu0 %v889_v4  ;;  %v897_v12 = vld [vmem:[%s1171_s2 + $0x60] sm:$0xff]   ;;  %v901_v16 = vld [vmem:[%s1171_s2 + $0x58] sm:$0xff]   ;;  %v905_v20 = vld [vmem:[%s1171_s2 + $0x50] sm:$0xff]  }
   0x6   :  { %841 = vmatprep.subr.bf16.mxu1 %v890_v5  ;;  %v898_v13 = vld [vmem:[%s1171_s2 + $0xe0] sm:$0xff]   ;;  %v902_v17 = vld [vmem:[%s1171_s2 + $0xd8] sm:$0xff]   ;;  %v906_v21 = vld [vmem:[%s1171_s2 + $0xd0] sm:$0xff]  }
   0x7   :  { %v899_v14 = vld [vmem:[%s1171_s2 + $0x20] sm:$0xff]   ;;  %v903_v18 = vld [vmem:[%s1171_s2 + $0x18] sm:$0xff]   ;;  %v907_v22 = vld [vmem:[%s1171_s2 + $0x10] sm:$0xff]  }
   0x8   :  { %820 = vmatpush3.bf16.msra.mxu0 %v891_v6  ;;  %v900_v15 = vld [vmem:[%s1171_s2 + $0xa0] sm:$0xff]   ;;  %v904_v19 = vld [vmem:[%s1171_s2 + $0x98] sm:$0xff]   ;;  %v908_v23 = vld [vmem:[%s1171_s2 + $0x90] sm:$0xff]  }
   0x9   :  { %842 = vmatpush3.bf16.msra.mxu1 %v892_v7  ;;  %821 = vmatprep.subr.bf16.mxu0 %v893_v8  ;;  %v909_v24 = vld [vmem:[%s1171_s2 + $0x48] sm:$0xff]   ;;  %v913_v28 = vld [vmem:[%s1171_s2 + $0x40] sm:$0xff]   ;;  %v921_v38 = vld [vmem:[%s1171_s2 + $0x178] sm:$0xff]  }
   0xa   :  { %843 = vmatprep.subr.bf16.mxu1 %v894_v9  ;;  %v910_v25 = vld [vmem:[%s1171_s2 + $0xc8] sm:$0xff]   ;;  %v914_v29 = vld [vmem:[%s1171_s2 + $0xc0] sm:$0xff]   ;;  %v922_v39 = vld [vmem:[%s1171_s2 + $0x138] sm:$0xff]  }
   0xb   :  { %v911_v26 = vld [vmem:[%s1171_s2 + $0x8] sm:$0xff]   ;;  %v915_v30 = vld [vmem:[%s1171_s2] sm:$0xff]   ;;  %v923_v40 = vld [vmem:[%s1171_s2 + $0x170] sm:$0xff]  }
   0xc   :  { %822 = vmatpush3.bf16.msra.mxu0 %v895_v10  ;;  %v912_v27 = vld [vmem:[%s1171_s2 + $0x88] sm:$0xff]   ;;  %v916_v31 = vld [vmem:[%s1171_s2 + $0x80] sm:$0xff]   ;;  %v924_v41 = vld [vmem:[%s1171_s2 + $0x130] sm:$0xff]  }
   0xd   :  { %844 = vmatpush3.bf16.msra.mxu1 %v896_v11  ;;  %823 = vmatprep.subr.bf16.mxu0 %v897_v12  ;;  %v18_v32 = vld [vmem:[%s1172_s1] sm:$0x77]  ;;  %v19_v33 = vld [vmem:[%s1172_s1 + $0x8] sm:$0x77]  ;;  %v929_v46 = vld [vmem:[%s1171_s2 + $0x158] sm:$0xff]  }
   0xe   :  { %845 = vmatprep.subr.bf16.mxu1 %v898_v13  ;;  %v754_v34 = vcombine.low %v18_v32, %v18_v32  ;;  %v755_v35 = vcombine.high %v18_v32, %v18_v32  ;;  %v756_v36 = vcombine.low %v19_v33, %v19_v33  ;;  %v757_v37 = vcombine.high %v19_v33, %v19_v33  ;;  %v925_v42 = vld [vmem:[%s1171_s2 + $0x168] sm:$0xff]   ;;  %v927_v44 = vld [vmem:[%s1171_s2 + $0x160] sm:$0xff]   ;;  %v20_v47 = vld [vmem:[%s1172_s1 + $0x10] sm:$0x77] }
   0xf   :  { %v926_v43 = vld [vmem:[%s1171_s2 + $0x128] sm:$0xff]   ;;  %v928_v45 = vld [vmem:[%s1171_s2 + $0x120] sm:$0xff]   ;;  %v759_v48 = vcombine.high %v20_v47, %v20_v47  ;;  %v930_v49 = vld [vmem:[%s1171_s2 + $0x118] sm:$0xff]   ;;  %v758_v56 = vcombine.low %v20_v47, %v20_v47 }
  0x10   :  { %824 = vmatpush3.bf16.msra.mxu0 %v899_v14  ;;  %458 = vmatprep.mubr.bf16.mxu0 %v755_v35  ;;  %v931_v50 = vld [vmem:[%s1171_s2 + $0x150] sm:$0xff]   ;;  %v933_v52 = vld [vmem:[%s1171_s2 + $0x148] sm:$0xff]   ;;  %v935_v54 = vld [vmem:[%s1171_s2 + $0x140] sm:$0xff]  }
  0x11   :  { %846 = vmatpush3.bf16.msra.mxu1 %v900_v15  ;;  %825 = vmatprep.subr.bf16.mxu0 %v901_v16  ;;  %v932_v51 = vld [vmem:[%s1171_s2 + $0x110] sm:$0xff]   ;;  %v934_v53 = vld [vmem:[%s1171_s2 + $0x108] sm:$0xff]   ;;  %v936_v55 = vld [vmem:[%s1171_s2 + $0x100] sm:$0xff]  }
  0x12   :  { %847 = vmatprep.subr.bf16.mxu1 %v902_v17  ;;  %498 = vmatprep.mubr.bf16.mxu1 %v757_v37  ;;  %v941_v16 = vld [vmem:[%s1173_s3 + $0x4] ss:$24 sps:$4 sm:$0x7f]   ;;  %v939_v17 = vld [vmem:[%s1173_s3] ss:$24 sps:$4 sm:$0x7f]  }
  0x13   :  { %v557_v33 = vld [vmem:[%s1174_s0] sm:$0x3] }
  0x14   :  { %826 = vmatpush3.bf16.msra.mxu0 %v903_v18  ;;  %v952_v18 = vmov 65535  }
  0x15   :  { %848 = vmatpush3.bf16.msra.mxu1 %v904_v19  ;;  %827 = vmatprep.subr.bf16.mxu0 %v905_v20  ;;  %v601_v19 = vsel %vm599_vm1, 4294967295, %v952_v18 }
  0x16   :  { %849 = vmatprep.subr.bf16.mxu1 %v906_v21  ;;  %v602_v20 = vsel %vm600_vm2, %v601_v19, 0 }
  0x17   :  { %v607_v21 = vand.u32 %v941_v16, %v602_v20 }
  0x18   :  { %828 = vmatpush3.bf16.msra.mxu0 %v907_v22  ;;  %v604_v22 = vand.u32 %v939_v17, %v602_v20 }
  0x19   :  { %850 = vmatpush3.bf16.msra.mxu1 %v908_v23  ;;  %829 = vmatprep.subr.bf16.mxu0 %v909_v24  ;;  %v942_v23 = vld [vmem:[%s1173_s3 + $0x8] ss:$24 sps:$4 sm:$0x7f]   ;;  %v953_v24 = vmov 0  }
  0x1a   :  { %851 = vmatprep.subr.bf16.mxu1 %v910_v25  ;;  %v944_v25 = vld [vmem:[%s1173_s3 + $0xc] ss:$24 sps:$4 sm:$0x7f]  }
  0x1c   :  { %830 = vmatpush3.bf16.msra.mxu0 %v911_v26  ;;  %v610_v26 = vand.u32 %v942_v23, %v602_v20 }
  0x1d   :  { %852 = vmatpush3.bf16.msra.mxu1 %v912_v27  ;;  %831 = vmatprep.subr.bf16.mxu0 %v913_v28  ;;  %v613_v27 = vand.u32 %v944_v25, %v602_v20  ;;  %v947_v28 = vld [vmem:[%s1173_s3 + $0x14] ss:$24 sps:$4 sm:$0x7f]  }
  0x1e   :  { %853 = vmatprep.subr.bf16.mxu1 %v914_v29  ;;  %v619_v29 = vand.u32 %v947_v28, %v602_v20 }
  0x20   :  { %832 = vmatpush3.bf16.msra.mxu0 %v915_v30  ;;  %v945_v30 = vld [vmem:[%s1173_s3 + $0x10] ss:$24 sps:$4 sm:$0x7f]  }
  0x21   :  { %854 = vmatpush3.bf16.msra.mxu1 %v916_v31  ;;  %861 = vmatprep.subr.bf16.mxu0 %v921_v38  ;;  %v616_v31 = vand.u32 %v945_v30, %v602_v20 }
  0x22   :  { %635 = vmatprep.subr.bf16.mxu1 %v607_v21 }
  0x23   :  { %459 = vmatmul.mubr.bf16.vlgmr.msra.gmra.mxu0 %v754_v34  ;;  %v558_v34 = vunpack.c.0.s8 %v557_v33 }
  0x24   :  { %499 = vmatmul.mubr.bf16.vlgmr.msra.gmra.mxu1 %v756_v36  ;;  %862 = vmatpush3.bf16.msra.mxu0 %v922_v39 }
  0x25   :  { %863 = vmatprep.subr.bf16.mxu0 %v923_v40  ;;  %538 = vmatprep.mubr.bf16.mxu0 %v759_v48  ;;  %v559_v35 = vand.u32 255, %v558_v34 }
  0x26   :  { %636 = vmatpush1.bf16.msra.mxu1 %v604_v22  ;;  %653 = vmatprep.mubr.bf16.mxu1 %v953_v24 }
  0x27   :  { %676 = vmatprep.subr.bf16.mxu1 %v613_v27  ;;  %v560_v36 = vcvt.s32.f32 %v559_v35 }
  0x28   :  { %864 = vmatpush3.bf16.msra.mxu0 %v924_v41 }
  0x29   :  { %865 = vmatprep.subr.bf16.mxu0 %v925_v42 }
  0x2c   :  { %866 = vmatpush3.bf16.msra.mxu0 %v926_v43 }
  0x2d   :  { %867 = vmatprep.subr.bf16.mxu0 %v927_v44 }
  0x30   :  { %868 = vmatpush3.bf16.msra.mxu0 %v928_v45 }
  0x31   :  { %869 = vmatprep.subr.bf16.mxu0 %v929_v46 }
  0x34   :  { %870 = vmatpush3.bf16.msra.mxu0 %v930_v49 }
  0x35   :  { %871 = vmatprep.subr.bf16.mxu0 %v931_v50 }
  0x38   :  { %872 = vmatpush3.bf16.msra.mxu0 %v932_v51 }
  0x39   :  { %873 = vmatprep.subr.bf16.mxu0 %v933_v52 }
  0x3c   :  { %874 = vmatpush3.bf16.msra.mxu0 %v934_v53 }
  0x3d   :  { %875 = vmatprep.subr.bf16.mxu0 %v935_v54 }
  0x40   :  { %876 = vmatpush3.bf16.msra.mxu0 %v936_v55 }
  0x43   :  { %539 = vmatmul.mubr.bf16.vlgmr.msra.gmra.mxu0 %v758_v56 }
  0xe3   :  { %v833_v57 = vpop.f32.mrf.mxu0 }
  0xe4   :  { %v855_v58 = vpop.f32.mrf.mxu1 }
  0xe5   :  { %v834_v59 = vpop.f32.mrf.mxu0 }
  0xe6   :  { %v856_v60 = vpop.f32.mrf.mxu1  ;;  %v835_v1 = vadd.f32 %v834_v59, %v833_v57 }
  0xe7   :  { %v836_v61 = vpop.f32.mrf.mxu0  ;;  %v857_v2 = vadd.f32 %v856_v60, %v855_v58 }
  0xe8   :  { %v858_v62 = vpop.f32.mrf.mxu1 }
  0xe9   :  { %v837_v63 = vpop.f32.mrf.mxu0  ;;  %v501_v5 = vadd.f32 %v857_v2, %v835_v1 }
  0xea   :  { %v859_v0 = vpop.f32.mrf.mxu1 }
 0x103   :  { %v877_v3 = vpop.f32.mrf.mxu0 }
 0x105   :  { %v878_v4 = vpop.f32.mrf.mxu0 }
 0x106   :  { %v879_v6 = vadd.f32 %v878_v4, %v877_v3 }
 0x107   :  { %v880_v7 = vpop.f32.mrf.mxu0 }
 0x108   :  { %v541_v8 = vadd.f32 %v879_v6, %v501_v5 }
 0x109   :  { %v881_v9 = vpop.f32.mrf.mxu0 }
 0x10a   :  { %v547_v10 = vsel %vm546_vm0, %v541_v8, -inf }
 0x10b   :  { %548 = vmax.xlane.f32.xlu0 %v547_v10 }
 0x194   :  { %v549_v11 = vpop.xlane.xlu0 %548 }
 0x195   :  { %v550_v12 = vsub.f32 %v541_v8, %v549_v11 }
 0x197   :  { %v551_v13 = vmul.f32 1.442695, %v550_v12 }
 0x199   :  { %948 = vpow2.f32 %v551_v13 }
 0x1a6   :  { %v949_v14 = vpop.eup %948 }
 0x1a7   :  { %v553_v15 = vsel %vm546_vm0, %v949_v14, 0.0  ;;  %v561_v38 = vmul.f32 %v949_v14, %v560_v36 }
 0x1a8   :  { %554 = vadd.xlane.f32.xlu0 %v553_v15 }
 0x231   :  { %v555_v32 = vpop.xlane.xlu0 %554 }
 0x232   :  { %950 = vrcp.f32 %v555_v32 }
 0x23f   :  { %v951_v37 = vpop.eup %950 }
 0x240   :  { %v562_v39 = vmul.f32 1.25, %v951_v37 }
 0x242   :  { %v563_v40 = vmul.f32 %v562_v39, %v561_v38 }
 0x244   :  { %v564_v41 = vpack.c.bf16 %v563_v40, %v563_v40 }
 0x246   :  { %814 = vmatmul.mubr.msk.bf16.vlgmr.msra.gmra.mxu1 %vm595_vm3, %v564_v41 }
 0x247   :  { %677 = vmatpush1.bf16.msra.mxu1 %v610_v26  ;;  %694 = vmatprep.mubr.bf16.mxu1 %v953_v24 }
 0x248   :  { %717 = vmatprep.subr.bf16.mxu1 %v619_v29 }
 0x24e   :  { %815 = vmatmul.mubr.msk.bf16.vlgmr.msra.gmra.mxu1 %vm595_vm3, %v564_v41 }
 0x24f   :  { %718 = vmatpush1.bf16.msra.mxu1 %v616_v31  ;;  %735 = vmatprep.mubr.bf16.mxu1 %v953_v24 }
 0x256   :  { %816 = vmatmul.mubr.msk.bf16.vlgmr.msra.gmra.mxu1 %vm595_vm3, %v564_v41 }
 0x306   :  { %v655_v42 = vpop.f32.mrf.mxu1 }
 0x307   :  { %744 = vst [vmem:[%s1175_s4] sm:$0x3f] %v655_v42 }
 0x308   :  { %v657_v43 = vpop.f32.mrf.mxu1 }
 0x309   :  { %745 = vst [vmem:[%s1175_s4 + $0x8] sm:$0x3f] %v657_v43 }
 0x30a   :  { %v659_v44 = vpop.f32.mrf.mxu1 }
 0x30c   :  { %v660_v45 = vpop.f32.mrf.mxu1 }
 0x30e   :  { %v696_v46 = vpop.f32.mrf.mxu1 }
 0x30f   :  { %746 = vst [vmem:[%s1175_s4 + $0x10] sm:$0x3f] %v696_v46 }
 0x310   :  { %v698_v47 = vpop.f32.mrf.mxu1 }
 0x311   :  { %747 = vst [vmem:[%s1175_s4 + $0x18] sm:$0x3f] %v698_v47 }
 0x312   :  { %v700_v48 = vpop.f32.mrf.mxu1 }
 0x314   :  { %v701_v49 = vpop.f32.mrf.mxu1 }
 0x316   :  { %v737_v50 = vpop.f32.mrf.mxu1 }
 0x317   :  { %748 = vst [vmem:[%s1175_s4 + $0x20] sm:$0x3f] %v737_v50 }
 0x318   :  { %v739_v51 = vpop.f32.mrf.mxu1 }
 0x319   :  { %749 = vst [vmem:[%s1175_s4 + $0x28] sm:$0x3f] %v739_v51 }
 0x31a   :  { %v741_v52 = vpop.f32.mrf.mxu1 }
 0x31c   :  { %v742_v53 = vpop.f32.mrf.mxu1 }

</bundles_post_ra>
